<compile_context>
chip_gen: v7x
topology: tpu7x:2x2x1
jax: 0.10.0
libtpu: 0.0.40
codegen_flags: <defaults>
</compile_context>

<pallas_src>
import jax
import jax.numpy as jnp
from jax.experimental import pallas as pl
from jax.experimental.pallas import tpu as pltpu

_LANES = 128
_SUBLANES = 8


def _make_kernel(inv_n: float):
    def kernel(yp_ref, yt_ref, out_ref, count_ref):
        pid = pl.program_id(0)

        @pl.when(pid == 0)
        def _():
            count_ref[...] = jnp.zeros_like(count_ref)

        # Cast in-kernel so sub-32-bit inputs travel through HBM at native width.
        yp = yp_ref[...].astype(jnp.float32)
        yt = yt_ref[...].astype(jnp.float32)
        diff = jnp.abs(yp - yt)
        # Divide-free equivalent of (|yp - yt| / yt > 0.025) for every sign of
        # y_true: yt < 0 gives a negative relative error (never flagged), and
        # yt == 0 matches the inf/NaN comparison behaviour of the reference.
        flags = jnp.logical_and(yt >= 0.0, diff > 0.025 * yt).astype(jnp.float32)
        count_ref[...] += jnp.sum(flags, keepdims=True)

        @pl.when(pid == pl.num_programs(0) - 1)
        def _():
            out_ref[...] = (1.0 - count_ref[...] * inv_n).astype(out_ref.dtype)

    return kernel


def temperature_accuracy_2_5(y_pred: jax.Array, y_true: jax.Array,
                             *, tile_rows: int = 2048) -> jax.Array:
    """Pallas equivalent of TemperatureAccuracy2_5.forward. Returns scalar f32."""
    assert y_pred.shape == y_true.shape and y_pred.ndim == 1
    n = y_pred.shape[0]

    # Lane/sublane-dense layout: (rows, 128) with rows a multiple of the
    # (sublane-aligned) tile height, so every block satisfies the (8,128) rule.
    rows_raw = -(-n // _LANES)
    rows_aligned = -(-rows_raw // _SUBLANES) * _SUBLANES
    tr = max(_SUBLANES, (min(tile_rows, rows_aligned) // _SUBLANES) * _SUBLANES)
    rows = -(-rows_aligned // tr) * tr
    pad = rows * _LANES - n

    # Pad both arrays with matching 1.0 values: zero error, never flagged;
    # the divisor stays the true N so the mean is unbiased.
    yp2 = jnp.pad(y_pred, (0, pad), constant_values=1.0).reshape(rows, _LANES)
    yt2 = jnp.pad(y_true, (0, pad), constant_values=1.0).reshape(rows, _LANES)

    # TODO(synk): f32 count accumulation loses exactness past ~2^24 flagged
    # elements; switch to int32 per-tile partials if batch can exceed ~16M.
    out = pl.pallas_call(
        _make_kernel(1.0 / float(n)),
        out_shape=jax.ShapeDtypeStruct((1, 1), jnp.float32),
        grid_spec=pltpu.PrefetchScalarGridSpec(
            num_scalar_prefetch=0,
            grid=(rows // tr,),
            in_specs=[
                pl.BlockSpec((tr, _LANES), lambda i: (i, 0)),
                pl.BlockSpec((tr, _LANES), lambda i: (i, 0)),
            ],
            out_specs=pl.BlockSpec((1, 1), lambda i: (0, 0)),
            scratch_shapes=[pltpu.VMEM((1, 1), jnp.float32)],
        ),
        compiler_params=pltpu.CompilerParams(
            dimension_semantics=("arbitrary",)),
    )(yp2, yt2)
    return out[0, 0]


def _ref_accuracy(y_pred, y_true):
    err = jnp.abs(y_pred - y_true) / y_true
    return 1.0 - jnp.mean(
        jnp.where(err > 0.025, 1.0, 0.0).astype(jnp.float32))


if __name__ == "__main__":
    key = jax.random.PRNGKey(0)
    k1, k2, k3, k4 = jax.random.split(key, 4)

    # --- test 1: tiny batch (module's nominal shape) ---
    batch = 8
    y_true = 250.0 + 100.0 * jax.random.uniform(k1, (batch,), dtype=jnp.float32)
    noise = 0.05 * (jax.random.uniform(k2, (batch,), dtype=jnp.float32) - 0.5)
    y_pred = y_true * (1.0 + noise)
    acc = temperature_accuracy_2_5(y_pred, y_true)
    jax.block_until_ready(acc)
    assert jnp.allclose(acc, _ref_accuracy(y_pred, y_true), atol=1e-6), acc

    # --- test 2: batch not a multiple of 128, multi-step grid (accumulator) ---
    batch2 = 4000
    y_true2 = 250.0 + 100.0 * jax.random.uniform(k3, (batch2,), dtype=jnp.float32)
    noise2 = 0.05 * (jax.random.uniform(k4, (batch2,), dtype=jnp.float32) - 0.5)
    y_pred2 = y_true2 * (1.0 + noise2)
    acc2 = temperature_accuracy_2_5(y_pred2, y_true2, tile_rows=8)
    jax.block_until_ready(acc2)
    assert jnp.allclose(acc2, _ref_accuracy(y_pred2, y_true2), atol=1e-6), acc2

    # --- test 3: mixed-sign y_true edge semantics match the reference ---
    y_true3 = jnp.array([-10.0, -1.0, 5.0, 100.0, 200.0, 300.0, 1.0, 2.0],
                        dtype=jnp.float32)
    y_pred3 = jnp.array([-10.5, -1.5, 5.2, 101.0, 220.0, 300.1, 1.0, 2.2],
                        dtype=jnp.float32)
    acc3 = temperature_accuracy_2_5(y_pred3, y_true3)
    jax.block_until_ready(acc3)
    assert jnp.allclose(acc3, _ref_accuracy(y_pred3, y_true3), atol=1e-6), acc3

    print("KERNEL_OK")
</pallas_src>

<mosaic_0001>
module attributes {stable_mosaic.version = 11 : i64} {
  func.func @kernel(%arg0: i32, %arg1: memref<8x128xf32, #tpu.memory_space<vmem>>, %arg2: memref<8x128xf32, #tpu.memory_space<vmem>>, %arg3: memref<1x1xf32, #tpu.memory_space<vmem>>, %arg4: memref<1x1xf32, #tpu.memory_space<vmem>>) attributes {dimension_semantics = [#tpu.dimension_semantics<arbitrary>], iteration_bounds = array<i64: 1>, scalar_prefetch = 0 : i64, scratch_operands = 1 : i64, tpu.core_type = #tpu.core_type<tc>, window_params = [{transform_indices = @transform_0, window_bounds = array<i64: 8, 128>}, {transform_indices = @transform_1, window_bounds = array<i64: 8, 128>}, {pipeline_mode = #tpu.pipeline_mode<synchronous>, transform_indices = @transform_2, window_bounds = array<i64: 1, 1>}]} {
    %c0_i32 = arith.constant 0 : i32
    %0 = arith.cmpi eq, %arg0, %c0_i32 : i32
    %1 = arith.extui %0 : i1 to i32
    %c0_i32_0 = arith.constant 0 : i32
    %2 = arith.cmpi ne, %1, %c0_i32_0 : i32
    scf.if %2 {
      %cst_12 = arith.constant 0.000000e+00 : f32
      %26 = vector.broadcast %cst_12 : f32 to vector<1x1xf32>
      %c0_13 = arith.constant 0 : index
      %c0_14 = arith.constant 0 : index
      %27 = vector.load %arg4[%c0_13, %c0_14] : memref<1x1xf32, #tpu.memory_space<vmem>>, vector<1x1xf32>
      tpu.vector_store %arg4[%c0_13, %c0_14], %26 {strides = array<i32>} : memref<1x1xf32, #tpu.memory_space<vmem>>, vector<1x1xf32>,
    } else {
    }
    %c0 = arith.constant 0 : index
    %c0_1 = arith.constant 0 : index
    %3 = vector.load %arg1[%c0, %c0_1] : memref<8x128xf32, #tpu.memory_space<vmem>>, vector<8x128xf32>
    %c0_2 = arith.constant 0 : index
    %c0_3 = arith.constant 0 : index
    %4 = vector.load %arg2[%c0_2, %c0_3] : memref<8x128xf32, #tpu.memory_space<vmem>>, vector<8x128xf32>
    %5 = arith.subf %3, %4 : vector<8x128xf32>
    %6 = math.absf %5 : vector<8x128xf32>
    %cst = arith.constant 0.000000e+00 : f32
    %7 = vector.broadcast %cst : f32 to vector<8x128xf32>
    %8 = arith.cmpf oge, %4, %7 : vector<8x128xf32>
    %cst_4 = arith.constant 2.500000e-02 : f32
    %9 = vector.broadcast %cst_4 : f32 to vector<8x128xf32>
    %10 = arith.mulf %9, %4 : vector<8x128xf32>
    %11 = arith.cmpf ogt, %6, %10 : vector<8x128xf32>
    %12 = arith.andi %8, %11 : vector<8x128xi1>
    %13 = arith.extui %12 : vector<8x128xi1> to vector<8x128xi32>
    %14 = arith.sitofp %13 : vector<8x128xi32> to vector<8x128xf32>
    %c0_5 = arith.constant 0 : index
    %c0_6 = arith.constant 0 : index
    %15 = vector.load %arg4[%c0_5, %c0_6] : memref<1x1xf32, #tpu.memory_space<vmem>>, vector<1x1xf32>
    %16 = vector.shape_cast %14 : vector<8x128xf32> to vector<1x8x128xf32>
    %cst_7 = arith.constant dense<0.000000e+00> : vector<1xf32>
    %17 = vector.multi_reduction <add>, %16, %cst_7 [1, 2] : vector<1x8x128xf32> to vector<1xf32>
    %18 = vector.shape_cast %17 : vector<1xf32> to vector<1x1x1xf32>
    %19 = vector.extract %18[0, 0, 0] : f32 from vector<1x1x1xf32>
    %20 = vector.broadcast %19 : f32 to vector<1x1xf32>
    %21 = arith.addf %15, %20 : vector<1x1xf32>
    %c0_8 = arith.constant 0 : index
    %c0_9 = arith.constant 0 : index
    %22 = vector.load %arg4[%c0_8, %c0_9] : memref<1x1xf32, #tpu.memory_space<vmem>>, vector<1x1xf32>
    tpu.vector_store %arg4[%c0_8, %c0_9], %21 {strides = array<i32>} : memref<1x1xf32, #tpu.memory_space<vmem>>, vector<1x1xf32>,
    %c0_i32_10 = arith.constant 0 : i32
    %23 = arith.cmpi eq, %arg0, %c0_i32_10 : i32
    %24 = arith.extui %23 : i1 to i32
    %c0_i32_11 = arith.constant 0 : i32
    %25 = arith.cmpi ne, %24, %c0_i32_11 : i32
    scf.if %25 {
      %c0_12 = arith.constant 0 : index
      %c0_13 = arith.constant 0 : index
      %26 = vector.load %arg4[%c0_12, %c0_13] : memref<1x1xf32, #tpu.memory_space<vmem>>, vector<1x1xf32>
      %cst_14 = arith.constant 1.250000e-01 : f32
      %27 = vector.broadcast %cst_14 : f32 to vector<1x1xf32>
      %28 = arith.mulf %26, %27 : vector<1x1xf32>
      %cst_15 = arith.constant 1.000000e+00 : f32
      %29 = vector.broadcast %cst_15 : f32 to vector<1x1xf32>
      %30 = arith.subf %29, %28 : vector<1x1xf32>
      %c0_16 = arith.constant 0 : index
      %c0_17 = arith.constant 0 : index
      %31 = vector.load %arg3[%c0_16, %c0_17] : memref<1x1xf32, #tpu.memory_space<vmem>>, vector<1x1xf32>
      tpu.vector_store %arg3[%c0_16, %c0_17], %30 {strides = array<i32>} : memref<1x1xf32, #tpu.memory_space<vmem>>, vector<1x1xf32>,
    } else {
    }
    return
  }
  func.func @transform_0(%arg0: i32) -> (i32, i32) {
    %c0_i32 = arith.constant 0 : i32
    %c0_i32_0 = arith.constant 0 : i32
    return %arg0, %c0_i32 : i32, i32
  }
  func.func @transform_1(%arg0: i32) -> (i32, i32) {
    %c0_i32 = arith.constant 0 : i32
    %c0_i32_0 = arith.constant 0 : i32
    return %arg0, %c0_i32 : i32, i32
  }
  func.func @transform_2(%arg0: i32) -> (i32, i32) {
    %c0_i32 = arith.constant 0 : i32
    %c0_i32_0 = arith.constant 0 : i32
    %c0_i32_1 = arith.constant 0 : i32
    return %c0_i32, %c0_i32_0 : i32, i32
  }
}

</mosaic_0001>

<bundles_post_ra>
// kernel: tpu_custom_call.1
= control target key start
LH: loop header
LB: loop body
LE: loop exit
PB: predicated region body
PF: predicated region fallthrough
CT: control target
= control target key end

     0   :  { %7 = vsyncpa [#allocation4], 0  ;;  %s226_s0 = inlined_call_operand.hbm [shape: f32[8,128], index: 0, kind: input, shape index: {}]   ;;  %s227_s1 = inlined_call_operand.hbm [shape: f32[8,128], index: 1, kind: input, shape index: {}]   ;;  %s228_s2 = inlined_call_operand.hbm [shape: f32[1,1], index: 2, kind: output, shape index: {}]  }
   0x1   :  { %8 = vsyncpa [#allocation7], 0 }
   0x2   :  { %9 = vsyncpa [#allocation5], 0  ;;  %s168_s9 = smov [#allocation3]   ;;  %s169_s11 = smov [#allocation6]  }
   0x3   :  { %s16_s10 = sshll.u32 %s168_s9, 4  ;;  %s26_s12 = sshll.u32 %s169_s11, 4  ;;  %s17_s10 = int_to_ptr.vmem [resolvable:$true] %s16_s10  ;;  %s27_s12 = int_to_ptr.vmem [resolvable:$true] %s26_s12 }
   0x4   :  { %s96_s15 = scalar_lea.hbm %s226_s0, 128 }
   0x5   :  { %p97_p0 = scmp.ne.s32.totalorder %s226_s0, %s96_s15  ;;  %p100_p1 = scmp.lt.u32.totalorder %s96_s15, %s226_s0 }
   0x7   :  { %p102_p2 = pnand %p100_p1, %p97_p0 }
   0x9   :  { %105 = shalt.err (!%p102_p2)
}
   0xa   :  { %s106_s20 = scalar_lea.vmem %s17_s10, 128  ;;  %p111_p4 = scmp.lt.s32.totalorder %s17_s10, %s17_s10 }
   0xb   :  { %p107_p3 = scmp.ne.s32.totalorder %s17_s10, %s106_s20  ;;  %p112_p5 = scmp.lt.s32.totalorder %s106_s20, %s106_s20 }
   0xd   :  { %p113_p6 = por %p112_p5, %p111_p4 }
   0xf   :  { %p114_p7 = pnand %p113_p6, %p107_p3 }
  0x11   :  { %117 = shalt.err (!%p114_p7)
}
  0x12   :  { %19 = dma.hbm_to_vmem [thread:$0]  %s226_s0, 128, %s17_s10, [#allocation4]  }
  0x13   :  { %s118_s25 = scalar_lea.hbm %s227_s1, 128 }
  0x14   :  { %p119_p8 = scmp.ne.s32.totalorder %s227_s1, %s118_s25  ;;  %p122_p9 = scmp.lt.u32.totalorder %s118_s25, %s227_s1 }
  0x16   :  { %p124_p10 = pnand %p122_p9, %p119_p8 }
  0x18   :  { %127 = shalt.err (!%p124_p10)
}
  0x19   :  { %s128_s30 = scalar_lea.vmem %s27_s12, 128  ;;  %p133_p12 = scmp.lt.s32.totalorder %s27_s12, %s27_s12 }
  0x1a   :  { %p129_p11 = scmp.ne.s32.totalorder %s27_s12, %s128_s30  ;;  %p134_p13 = scmp.lt.s32.totalorder %s128_s30, %s128_s30 }
  0x1c   :  { %p135_p0 = por %p134_p13, %p133_p12 }
  0x1e   :  { %p136_p1 = pnand %p135_p0, %p129_p11 }
  0x20   :  { %139 = shalt.err (!%p136_p1)
}
  0x21   :  { %29 = dma.hbm_to_vmem [thread:$0]  %s227_s1, 128, %s27_s12, [#allocation7]  }
  0x22   :  { %162 = dma.done.wait [#allocation4], 128  }
  0x23   :  { %163 = vsyncadd [#allocation4], 4294967168 }
  0x24   :  { %164 = dma.done.wait [#allocation7], 128  }
  0x25   :  { %165 = vsyncadd [#allocation7], 4294967168  ;;  %vm40_vm0 = vcmask 0   ;;  %v170_v0 = vmov 0.0   ;;  %v42_v1 = vld [vmem:[#allocation3] sm:$0xff]  ;;  %v43_v2 = vld [vmem:[#allocation6] sm:$0xff] }
  0x26   :  { %41 = vst.msk [vmem:[#allocation2] sm:$0x1] %vm40_vm0, %v170_v0  ;;  %v44_v3 = vsub.f32 %v42_v1, %v43_v2  ;;  %v47_v4 = vmul.f32 0.025, %v43_v2  ;;  %vm46_vm1 = vcmp.ge.f32.partialorder %v43_v2, 0.0  ;;  %s171_s4 = smov [#allocation8]  }
  0x27   :  { %s79_s5 = sshll.u32 %s171_s4, 4  ;;  %s80_s5 = int_to_ptr.vmem [resolvable:$true] %s79_s5 }
  0x28   :  { %v45_v5 = vand.u32 2147483647, %v44_v3  ;;  %s140_s6 = scalar_lea.vmem %s80_s5, 16  ;;  %s144_s7 = scalar_lea.vmem %s80_s5, 32 }
  0x29   :  { %p141_p2 = scmp.ne.s32.totalorder %s80_s5, %s140_s6  ;;  %p145_p3 = scmp.lt.s32.totalorder %s80_s5, %s80_s5 }
  0x2a   :  { %vm48_vm2 = vcmp.gt.f32.partialorder %v45_v5, %v47_v4  ;;  %p146_p4 = scmp.lt.s32.totalorder %s144_s7, %s140_s6 }
  0x2b   :  { %vm49_vm3 = vmand %vm46_vm1, %vm48_vm2 }
  0x2c   :  { %v89_v6 = vsel %vm49_vm3, 1.0, %v170_v0  ;;  %p147_p5 = por %p146_p4, %p145_p3 }
  0x2d   :  { %53 = vadd.xlane.f32.xlu0 %v89_v6  ;;  %v52_v14 = vld [vmem:[#allocation2] sm:$0x1] }
  0x2e   :  { %p148_p6 = pnand %p147_p5, %p141_p2 }
  0xba   :  { %v54_v7 = vpop.xlane.xlu0 %53 }
  0xbb   :  { %v55_v8 = vrot.slane %v54_v7, 4 }
  0xbd   :  { %v56_v9 = vadd.f32 %v55_v8, %v54_v7 }
  0xbf   :  { %v57_v10 = vrot.slane %v56_v9, 2 }
  0xc1   :  { %v58_v11 = vadd.f32 %v57_v10, %v56_v9 }
  0xc3   :  { %v59_v12 = vrot.slane %v58_v11, 1 }
  0xc5   :  { %v60_v13 = vadd.f32 %v59_v12, %v58_v11 }
  0xc7   :  { %90 = vpush %v60_v13 }
  0xf8   :  { %s91_s1 = spop %90 }
  0xf9   :  { %v62_v15 = vstv %s91_s1 }
  0xfa   :  { %v63_v16 = vadd.f32 %v62_v15, %v52_v14 }
  0xfc   :  { %65 = vst.msk [vmem:[#allocation2] sm:$0x1] %vm40_vm0, %v63_v16 }
 0x103   :  { %v69_v17 = vld [vmem:[#allocation2] sm:$0x1] }
 0x104   :  { %v70_v18 = vmul.f32 0.125, %v69_v17 }
 0x106   :  { %v71_v19 = vsub.f32 1.0, %v70_v18 }
 0x108   :  { %72 = vst.msk [vmem:[#allocation8] sm:$0x1] %vm40_vm0, %v71_v19 }
 0x109   :  { %151 = shalt.err (!%p148_p6)
}
 0x10a   :  { %s152_s10 = scalar_lea.hbm %s228_s2, 16 }
 0x10b   :  { %p153_p7 = scmp.ne.s32.totalorder %s228_s2, %s152_s10  ;;  %p156_p8 = scmp.lt.u32.totalorder %s152_s10, %s228_s2 }
 0x10d   :  { %p158_p9 = pnand %p156_p8, %p153_p7 }
 0x10f   :  { %161 = shalt.err (!%p158_p9)
}
 0x110   :  { %82 = dma.vmem_to_hbm [thread:$0]  %s80_s5, 16, %s228_s2, [#allocation5]  }
 0x111   :  { %166 = dma.done.wait [#allocation5], 16  }
 0x112   :  { %167 = vsyncadd [#allocation5], 4294967280 }
 0x113   :  { %86 = vsyncpa [#allocation4], 1 }
 0x114   :  { %87 = vsyncpa [#allocation7], 1 }
 0x115   :  { %88 = vsyncpa [#allocation5], 1 }

</bundles_post_ra>
